<compile_context>
chip_gen: v5e
topology: v5e:2x2
jax: 0.10.0
libtpu: 0.0.40
codegen_flags: <defaults>
</compile_context>

<pallas_src>
import jax
import jax.numpy as jnp
from jax.experimental import pallas as pl
from jax.experimental.pallas import tpu as pltpu


_LANES = 128     # batch items per row of the interleaved view
_HIDDEN = 16


def _round_up(n, m):
    return ((n + m - 1) // m) * m


def _choose_block_rows(m_rows, target_rows):
    """Rows (of 128 batch items each) per grid step."""
    target = max(8, (int(target_rows) // 8) * 8)
    if m_rows <= 8:
        return m_rows                                   # one full-extent block
    if m_rows <= target:
        if m_rows >= 16:
            # Prefer >= 2 grid steps so both v7x TensorCores get work.
            return _round_up(pl.cdiv(m_rows, 2), 8)
        return m_rows                                   # 9..15 rows: single block
    return target                                       # multiple of 8, grid >= 2


def _mlp_kernel(xv_ref, d_ref, p_ref, o_ref):
    """One batch tile of y = relu(x @ W1 + b1) @ W2 + b2.

    xv_ref: (tm, 256) VMEM  lane-interleaved inputs: lane 2l -> feature 0,
                            lane 2l+1 -> feature 1, 128 batch items per row.
    d_ref : (256, 256) VMEM resident 0/1 de-interleave matrix.
    p_ref : (5, 16)   SMEM  rows = [W1[0,:], W1[1,:], b1, W2[:,0], b2 (bcast)].
    o_ref : (tm, 128) VMEM  one output per batch item (lane-dense).
    """
    # De-interleave on the (otherwise idle) MXU: (tm,256) @ (256,256) -> [x0 | x1].
    xc = jnp.dot(xv_ref[...], d_ref[...], preferred_element_type=jnp.float32)
    x0 = xc[:, :_LANES]                                  # (tm, 128) feature 0
    x1 = xc[:, _LANES:]                                  # (tm, 128) feature 1

    # fc1 + ReLU + fc2 on the VPU; weights consumed as SMEM scalar operands
    # (no lane/sublane broadcast instructions).
    acc = jnp.zeros_like(x0)
    for j in range(_HIDDEN):                             # static unroll, 16 units
        h = x0 * p_ref[0, j] + x1 * p_ref[1, j] + p_ref[2, j]
        acc = acc + jnp.maximum(h, 0.0) * p_ref[3, j]
    o_ref[...] = acc + p_ref[4, 0]


def simple_nn_forward(x, w1, b1, w2, b2, *, block_rows=256):
    """Forward pass of SimpleNN.  x: (B, 2) float32 -> (B, 1) float32.

    w1: (2, 16)  (PyTorch fc1.weight.T)     b1: (16,) or (1, 16)
    w2: (16, 1)  (PyTorch fc2.weight.T)     b2: scalar / (1,) / (1, 1)
    block_rows: rows of 128 batch items per grid step (256 -> 32768 items/step;
                raise toward 512 for very large batches, capped for v7x VMEM).
    """
    x = jnp.asarray(x, jnp.float32)
    batch = x.shape[0]

    # Pad only to the 128-item lane granularity (never to a multiple of the tile).
    bp = _round_up(max(batch, 1), _LANES)
    if bp != batch:
        x = jnp.pad(x, ((0, bp - batch), (0, 0)))
    m_rows = bp // _LANES
    xv = x.reshape(m_rows, 2 * _LANES)                    # zero-copy row-major view

    tm = _choose_block_rows(m_rows, block_rows)
    grid = (pl.cdiv(m_rows, tm),)                         # ragged last block allowed

    # Resident 0/1 de-interleave matrix: output col l selects lane 2l (feature 0),
    # output col 128+l selects lane 2l+1 (feature 1).
    lane = jnp.arange(_LANES)
    dmat = jnp.zeros((2 * _LANES, 2 * _LANES), jnp.float32)
    dmat = dmat.at[2 * lane, lane].set(1.0)
    dmat = dmat.at[2 * lane + 1, _LANES + lane].set(1.0)

    # All 65 scalars packed into one SMEM tile.
    params = jnp.concatenate(
        [jnp.asarray(w1, jnp.float32).reshape(2, _HIDDEN),
         jnp.asarray(b1, jnp.float32).reshape(1, _HIDDEN),
         jnp.asarray(w2, jnp.float32).reshape(1, _HIDDEN),
         jnp.broadcast_to(jnp.asarray(b2, jnp.float32).reshape(1, 1), (1, _HIDDEN))],
        axis=0)                                           # (5, 16)

    # VMEM budget: double-buffered in/out blocks + resident D + matmul/spill scratch.
    block_bytes = tm * 2 * _LANES * 4
    vmem_limit = int(min(64 * 2 ** 20, max(16 * 2 ** 20, 16 * block_bytes)))

    cost = pl.CostEstimate(
        flops=int(bp) * (2 * 2 * 2 * _LANES + 2 * 2 * _HIDDEN + 2 * _HIDDEN),
        transcendentals=0,
        bytes_accessed=int(bp) * 12 + (2 * _LANES) ** 2 * 4 + 5 * _HIDDEN * 4,
    )

    out = pl.pallas_call(
        _mlp_kernel,
        out_shape=jax.ShapeDtypeStruct((m_rows, _LANES), jnp.float32),
        grid=grid,
        in_specs=[
            pl.BlockSpec((tm, 2 * _LANES), lambda i: (i, 0)),          # streaming x
            pl.BlockSpec((2 * _LANES, 2 * _LANES), lambda i: (0, 0)),  # resident D
            pl.BlockSpec(memory_space=pltpu.MemorySpace.SMEM),         # scalar params
        ],
        out_specs=pl.BlockSpec((tm, _LANES), lambda i: (i, 0)),        # lane-dense y
        compiler_params=pltpu.CompilerParams(
            dimension_semantics=("parallel",),       # megacore sharding on v7x
            vmem_limit_bytes=vmem_limit,
        ),
        cost_estimate=cost,
    )(xv, dmat, params)

    # (m_rows, 128) -> (bp,) is a contiguous (free) reshape; the final slice is a
    # no-op when B is already 128-aligned.
    return out.reshape(bp)[:batch].reshape(batch, 1)


def _reference(x, w1, b1, w2, b2):
    """Pure elementwise/broadcast f32 reference (no reduced-precision matmuls)."""
    x = jnp.asarray(x, jnp.float32)
    w1 = jnp.asarray(w1, jnp.float32).reshape(2, _HIDDEN)
    b1 = jnp.asarray(b1, jnp.float32).reshape(1, _HIDDEN)
    w2 = jnp.asarray(w2, jnp.float32).reshape(1, _HIDDEN)
    b2 = jnp.asarray(b2, jnp.float32).reshape(())
    h = jnp.maximum(x[:, 0:1] * w1[0] + x[:, 1:2] * w1[1] + b1, 0.0)
    return jnp.sum(h * w2, axis=1, keepdims=True) + b2


def init_params(key):
    """Deterministic init mirroring nn.Linear's U(-1/sqrt(fan_in), 1/sqrt(fan_in))."""
    k1, k2, k3, k4 = jax.random.split(key, 4)
    bound1 = 1.0 / jnp.sqrt(2.0)
    w1 = jax.random.uniform(k1, (2, 16), jnp.float32, -bound1, bound1)   # torch weight.T
    b1 = jax.random.uniform(k2, (1, 16), jnp.float32, -bound1, bound1)
    bound2 = 1.0 / jnp.sqrt(16.0)
    w2 = jax.random.uniform(k3, (16, 1), jnp.float32, -bound2, bound2)
    b2 = jax.random.uniform(k4, (1, 1), jnp.float32, -bound2, bound2)
    return w1, b1, w2, b2


if __name__ == "__main__":
    key = jax.random.PRNGKey(0)
    kx, kp = jax.random.split(key)
    w1, b1, w2, b2 = init_params(kp)

    fwd = jax.jit(simple_nn_forward, static_argnames=("block_rows",))

    # Small 128-aligned case: B = 256 -> zero-copy input view, single grid step.
    B = 256
    x = jax.random.normal(kx, (B, 2), jnp.float32)
    out = jax.block_until_ready(fwd(x, w1, b1, w2, b2))
    ref = _reference(x, w1, b1, w2, b2)
    assert out.shape == (B, 1)
    assert jnp.allclose(out, ref, atol=1e-5, rtol=1e-5), \
        float(jnp.max(jnp.abs(out - ref)))

    # Ragged batch: B = 1200 -> padded to 1280 (10 rows of 128), 2 grid steps of
    # 8 rows with a ragged, masked last block.
    B2 = 1200
    x2 = jax.random.normal(jax.random.PRNGKey(1), (B2, 2), jnp.float32)
    out2 = jax.block_until_ready(fwd(x2, w1, b1, w2, b2, block_rows=8))
    ref2 = _reference(x2, w1, b1, w2, b2)
    assert out2.shape == (B2, 1)
    assert jnp.allclose(out2, ref2, atol=1e-5, rtol=1e-5), \
        float(jnp.max(jnp.abs(out2 - ref2)))

    print("KERNEL_OK")
</pallas_src>

<mosaic_0001>
module attributes {stable_mosaic.version = 11 : i64} {
  func.func @_mlp_kernel(%arg0: i32, %arg1: memref<2x256xf32, #tpu.memory_space<vmem>>, %arg2: memref<256x256xf32, #tpu.memory_space<vmem>>, %arg3: memref<5x16xf32, #tpu.memory_space<smem>>, %arg4: memref<2x128xf32, #tpu.memory_space<vmem>>) attributes {dimension_semantics = [#tpu.dimension_semantics<parallel>], iteration_bounds = array<i64: 1>, scalar_prefetch = 0 : i64, scratch_operands = 0 : i64, tpu.core_type = #tpu.core_type<tc>, window_params = [{transform_indices = @transform_0, window_bounds = array<i64: 2, 256>}, {pipeline_mode = #tpu.pipeline_mode<synchronous>, transform_indices = @transform_1, window_bounds = array<i64: 256, 256>}, {transform_indices = @transform_2, window_bounds = array<i64: 5, 16>}, {transform_indices = @transform_3, window_bounds = array<i64: 2, 128>}]} {
    %c0 = arith.constant 0 : index
    %c0_0 = arith.constant 0 : index
    %0 = vector.load %arg1[%c0, %c0_0] : memref<2x256xf32, #tpu.memory_space<vmem>>, vector<2x256xf32>
    %c0_1 = arith.constant 0 : index
    %c0_2 = arith.constant 0 : index
    %1 = vector.load %arg2[%c0_1, %c0_2] : memref<256x256xf32, #tpu.memory_space<vmem>>, vector<256x256xf32>
    %cst = arith.constant dense<0.000000e+00> : vector<2x256xf32>
    %2 = tpu.matmul %0, %1, %cst {dimension_numbers = #tpu.dot_dimension_numbers<[1], [0], [0], [1], [0, 0, 1, 1], [], []>} : vector<2x256xf32>, vector<256x256xf32>, vector<2x256xf32> -> vector<2x256xf32>
    %3 = vector.extract_strided_slice %2 {offsets = [0, 0], sizes = [2, 128], strides = [1, 1]} : vector<2x256xf32> to vector<2x128xf32>
    %4 = vector.extract_strided_slice %2 {offsets = [0, 128], sizes = [2, 128], strides = [1, 1]} : vector<2x256xf32> to vector<2x128xf32>
    %cst_3 = arith.constant 0.000000e+00 : f32
    %5 = vector.broadcast %cst_3 : f32 to vector<2x128xf32>
    %c0_4 = arith.constant 0 : index
    %c0_5 = arith.constant 0 : index
    %6 = memref.load %arg3[%c0_4, %c0_5] : memref<5x16xf32, #tpu.memory_space<smem>>
    %7 = vector.broadcast %6 : f32 to vector<2x128xf32>
    %8 = arith.mulf %3, %7 : vector<2x128xf32>
    %c1 = arith.constant 1 : index
    %c0_6 = arith.constant 0 : index
    %9 = memref.load %arg3[%c1, %c0_6] : memref<5x16xf32, #tpu.memory_space<smem>>
    %10 = vector.broadcast %9 : f32 to vector<2x128xf32>
    %11 = arith.mulf %4, %10 : vector<2x128xf32>
    %12 = arith.addf %8, %11 : vector<2x128xf32>
    %c2 = arith.constant 2 : index
    %c0_7 = arith.constant 0 : index
    %13 = memref.load %arg3[%c2, %c0_7] : memref<5x16xf32, #tpu.memory_space<smem>>
    %14 = vector.broadcast %13 : f32 to vector<2x128xf32>
    %15 = arith.addf %12, %14 : vector<2x128xf32>
    %cst_8 = arith.constant 0.000000e+00 : f32
    %16 = vector.broadcast %cst_8 : f32 to vector<2x128xf32>
    %17 = arith.maximumf %15, %16 : vector<2x128xf32>
    %c3 = arith.constant 3 : index
    %c0_9 = arith.constant 0 : index
    %18 = memref.load %arg3[%c3, %c0_9] : memref<5x16xf32, #tpu.memory_space<smem>>
    %19 = vector.broadcast %18 : f32 to vector<2x128xf32>
    %20 = arith.mulf %17, %19 : vector<2x128xf32>
    %21 = arith.addf %5, %20 : vector<2x128xf32>
    %c0_10 = arith.constant 0 : index
    %c1_11 = arith.constant 1 : index
    %22 = memref.load %arg3[%c0_10, %c1_11] : memref<5x16xf32, #tpu.memory_space<smem>>
    %23 = vector.broadcast %22 : f32 to vector<2x128xf32>
    %24 = arith.mulf %3, %23 : vector<2x128xf32>
    %c1_12 = arith.constant 1 : index
    %c1_13 = arith.constant 1 : index
    %25 = memref.load %arg3[%c1_12, %c1_13] : memref<5x16xf32, #tpu.memory_space<smem>>
    %26 = vector.broadcast %25 : f32 to vector<2x128xf32>
    %27 = arith.mulf %4, %26 : vector<2x128xf32>
    %28 = arith.addf %24, %27 : vector<2x128xf32>
    %c2_14 = arith.constant 2 : index
    %c1_15 = arith.constant 1 : index
    %29 = memref.load %arg3[%c2_14, %c1_15] : memref<5x16xf32, #tpu.memory_space<smem>>
    %30 = vector.broadcast %29 : f32 to vector<2x128xf32>
    %31 = arith.addf %28, %30 : vector<2x128xf32>
    %cst_16 = arith.constant 0.000000e+00 : f32
    %32 = vector.broadcast %cst_16 : f32 to vector<2x128xf32>
    %33 = arith.maximumf %31, %32 : vector<2x128xf32>
    %c3_17 = arith.constant 3 : index
    %c1_18 = arith.constant 1 : index
    %34 = memref.load %arg3[%c3_17, %c1_18] : memref<5x16xf32, #tpu.memory_space<smem>>
    %35 = vector.broadcast %34 : f32 to vector<2x128xf32>
    %36 = arith.mulf %33, %35 : vector<2x128xf32>
    %37 = arith.addf %21, %36 : vector<2x128xf32>
    %c0_19 = arith.constant 0 : index
    %c2_20 = arith.constant 2 : index
    %38 = memref.load %arg3[%c0_19, %c2_20] : memref<5x16xf32, #tpu.memory_space<smem>>
    %39 = vector.broadcast %38 : f32 to vector<2x128xf32>
    %40 = arith.mulf %3, %39 : vector<2x128xf32>
    %c1_21 = arith.constant 1 : index
    %c2_22 = arith.constant 2 : index
    %41 = memref.load %arg3[%c1_21, %c2_22] : memref<5x16xf32, #tpu.memory_space<smem>>
    %42 = vector.broadcast %41 : f32 to vector<2x128xf32>
    %43 = arith.mulf %4, %42 : vector<2x128xf32>
    %44 = arith.addf %40, %43 : vector<2x128xf32>
    %c2_23 = arith.constant 2 : index
    %c2_24 = arith.constant 2 : index
    %45 = memref.load %arg3[%c2_23, %c2_24] : memref<5x16xf32, #tpu.memory_space<smem>>
    %46 = vector.broadcast %45 : f32 to vector<2x128xf32>
    %47 = arith.addf %44, %46 : vector<2x128xf32>
    %cst_25 = arith.constant 0.000000e+00 : f32
    %48 = vector.broadcast %cst_25 : f32 to vector<2x128xf32>
    %49 = arith.maximumf %47, %48 : vector<2x128xf32>
    %c3_26 = arith.constant 3 : index
    %c2_27 = arith.constant 2 : index
    %50 = memref.load %arg3[%c3_26, %c2_27] : memref<5x16xf32, #tpu.memory_space<smem>>
    %51 = vector.broadcast %50 : f32 to vector<2x128xf32>
    %52 = arith.mulf %49, %51 : vector<2x128xf32>
    %53 = arith.addf %37, %52 : vector<2x128xf32>
    %c0_28 = arith.constant 0 : index
    %c3_29 = arith.constant 3 : index
    %54 = memref.load %arg3[%c0_28, %c3_29] : memref<5x16xf32, #tpu.memory_space<smem>>
    %55 = vector.broadcast %54 : f32 to vector<2x128xf32>
    %56 = arith.mulf %3, %55 : vector<2x128xf32>
    %c1_30 = arith.constant 1 : index
    %c3_31 = arith.constant 3 : index
    %57 = memref.load %arg3[%c1_30, %c3_31] : memref<5x16xf32, #tpu.memory_space<smem>>
    %58 = vector.broadcast %57 : f32 to vector<2x128xf32>
    %59 = arith.mulf %4, %58 : vector<2x128xf32>
    %60 = arith.addf %56, %59 : vector<2x128xf32>
    %c2_32 = arith.constant 2 : index
    %c3_33 = arith.constant 3 : index
    %61 = memref.load %arg3[%c2_32, %c3_33] : memref<5x16xf32, #tpu.memory_space<smem>>
    %62 = vector.broadcast %61 : f32 to vector<2x128xf32>
    %63 = arith.addf %60, %62 : vector<2x128xf32>
    %cst_34 = arith.constant 0.000000e+00 : f32
    %64 = vector.broadcast %cst_34 : f32 to vector<2x128xf32>
    %65 = arith.maximumf %63, %64 : vector<2x128xf32>
    %c3_35 = arith.constant 3 : index
    %c3_36 = arith.constant 3 : index
    %66 = memref.load %arg3[%c3_35, %c3_36] : memref<5x16xf32, #tpu.memory_space<smem>>
    %67 = vector.broadcast %66 : f32 to vector<2x128xf32>
    %68 = arith.mulf %65, %67 : vector<2x128xf32>
    %69 = arith.addf %53, %68 : vector<2x128xf32>
    %c0_37 = arith.constant 0 : index
    %c4 = arith.constant 4 : index
    %70 = memref.load %arg3[%c0_37, %c4] : memref<5x16xf32, #tpu.memory_space<smem>>
    %71 = vector.broadcast %70 : f32 to vector<2x128xf32>
    %72 = arith.mulf %3, %71 : vector<2x128xf32>
    %c1_38 = arith.constant 1 : index
    %c4_39 = arith.constant 4 : index
    %73 = memref.load %arg3[%c1_38, %c4_39] : memref<5x16xf32, #tpu.memory_space<smem>>
    %74 = vector.broadcast %73 : f32 to vector<2x128xf32>
    %75 = arith.mulf %4, %74 : vector<2x128xf32>
    %76 = arith.addf %72, %75 : vector<2x128xf32>
    %c2_40 = arith.constant 2 : index
    %c4_41 = arith.constant 4 : index
    %77 = memref.load %arg3[%c2_40, %c4_41] : memref<5x16xf32, #tpu.memory_space<smem>>
    %78 = vector.broadcast %77 : f32 to vector<2x128xf32>
    %79 = arith.addf %76, %78 : vector<2x128xf32>
    %cst_42 = arith.constant 0.000000e+00 : f32
    %80 = vector.broadcast %cst_42 : f32 to vector<2x128xf32>
    %81 = arith.maximumf %79, %80 : vector<2x128xf32>
    %c3_43 = arith.constant 3 : index
    %c4_44 = arith.constant 4 : index
    %82 = memref.load %arg3[%c3_43, %c4_44] : memref<5x16xf32, #tpu.memory_space<smem>>
    %83 = vector.broadcast %82 : f32 to vector<2x128xf32>
    %84 = arith.mulf %81, %83 : vector<2x128xf32>
    %85 = arith.addf %69, %84 : vector<2x128xf32>
    %c0_45 = arith.constant 0 : index
    %c5 = arith.constant 5 : index
    %86 = memref.load %arg3[%c0_45, %c5] : memref<5x16xf32, #tpu.memory_space<smem>>
    %87 = vector.broadcast %86 : f32 to vector<2x128xf32>
    %88 = arith.mulf %3, %87 : vector<2x128xf32>
    %c1_46 = arith.constant 1 : index
    %c5_47 = arith.constant 5 : index
    %89 = memref.load %arg3[%c1_46, %c5_47] : memref<5x16xf32, #tpu.memory_space<smem>>
    %90 = vector.broadcast %89 : f32 to vector<2x128xf32>
    %91 = arith.mulf %4, %90 : vector<2x128xf32>
    %92 = arith.addf %88, %91 : vector<2x128xf32>
    %c2_48 = arith.constant 2 : index
    %c5_49 = arith.constant 5 : index
    %93 = memref.load %arg3[%c2_48, %c5_49] : memref<5x16xf32, #tpu.memory_space<smem>>
    %94 = vector.broadcast %93 : f32 to vector<2x128xf32>
    %95 = arith.addf %92, %94 : vector<2x128xf32>
    %cst_50 = arith.constant 0.000000e+00 : f32
    %96 = vector.broadcast %cst_50 : f32 to vector<2x128xf32>
    %97 = arith.maximumf %95, %96 : vector<2x128xf32>
    %c3_51 = arith.constant 3 : index
    %c5_52 = arith.constant 5 : index
    %98 = memref.load %arg3[%c3_51, %c5_52] : memref<5x16xf32, #tpu.memory_space<smem>>
    %99 = vector.broadcast %98 : f32 to vector<2x128xf32>
    %100 = arith.mulf %97, %99 : vector<2x128xf32>
    %101 = arith.addf %85, %100 : vector<2x128xf32>
    %c0_53 = arith.constant 0 : index
    %c6 = arith.constant 6 : index
    %102 = memref.load %arg3[%c0_53, %c6] : memref<5x16xf32, #tpu.memory_space<smem>>
    %103 = vector.broadcast %102 : f32 to vector<2x128xf32>
    %104 = arith.mulf %3, %103 : vector<2x128xf32>
    %c1_54 = arith.constant 1 : index
    %c6_55 = arith.constant 6 : index
    %105 = memref.load %arg3[%c1_54, %c6_55] : memref<5x16xf32, #tpu.memory_space<smem>>
    %106 = vector.broadcast %105 : f32 to vector<2x128xf32>
    %107 = arith.mulf %4, %106 : vector<2x128xf32>
    %108 = arith.addf %104, %107 : vector<2x128xf32>
    %c2_56 = arith.constant 2 : index
    %c6_57 = arith.constant 6 : index
    %109 = memref.load %arg3[%c2_56, %c6_57] : memref<5x16xf32, #tpu.memory_space<smem>>
    %110 = vector.broadcast %109 : f32 to vector<2x128xf32>
    %111 = arith.addf %108, %110 : vector<2x128xf32>
    %cst_58 = arith.constant 0.000000e+00 : f32
    %112 = vector.broadcast %cst_58 : f32 to vector<2x128xf32>
    %113 = arith.maximumf %111, %112 : vector<2x128xf32>
    %c3_59 = arith.constant 3 : index
    %c6_60 = arith.constant 6 : index
    %114 = memref.load %arg3[%c3_59, %c6_60] : memref<5x16xf32, #tpu.memory_space<smem>>
    %115 = vector.broadcast %114 : f32 to vector<2x128xf32>
    %116 = arith.mulf %113, %115 : vector<2x128xf32>
    %117 = arith.addf %101, %116 : vector<2x128xf32>
    %c0_61 = arith.constant 0 : index
    %c7 = arith.constant 7 : index
    %118 = memref.load %arg3[%c0_61, %c7] : memref<5x16xf32, #tpu.memory_space<smem>>
    %119 = vector.broadcast %118 : f32 to vector<2x128xf32>
    %120 = arith.mulf %3, %119 : vector<2x128xf32>
    %c1_62 = arith.constant 1 : index
    %c7_63 = arith.constant 7 : index
    %121 = memref.load %arg3[%c1_62, %c7_63] : memref<5x16xf32, #tpu.memory_space<smem>>
    %122 = vector.broadcast %121 : f32 to vector<2x128xf32>
    %123 = arith.mulf %4, %122 : vector<2x128xf32>
    %124 = arith.addf %120, %123 : vector<2x128xf32>
    %c2_64 = arith.constant 2 : index
    %c7_65 = arith.constant 7 : index
    %125 = memref.load %arg3[%c2_64, %c7_65] : memref<5x16xf32, #tpu.memory_space<smem>>
    %126 = vector.broadcast %125 : f32 to vector<2x128xf32>
    %127 = arith.addf %124, %126 : vector<2x128xf32>
    %cst_66 = arith.constant 0.000000e+00 : f32
    %128 = vector.broadcast %cst_66 : f32 to vector<2x128xf32>
    %129 = arith.maximumf %127, %128 : vector<2x128xf32>
    %c3_67 = arith.constant 3 : index
    %c7_68 = arith.constant 7 : index
    %130 = memref.load %arg3[%c3_67, %c7_68] : memref<5x16xf32, #tpu.memory_space<smem>>
    %131 = vector.broadcast %130 : f32 to vector<2x128xf32>
    %132 = arith.mulf %129, %131 : vector<2x128xf32>
    %133 = arith.addf %117, %132 : vector<2x128xf32>
    %c0_69 = arith.constant 0 : index
    %c8 = arith.constant 8 : index
    %134 = memref.load %arg3[%c0_69, %c8] : memref<5x16xf32, #tpu.memory_space<smem>>
    %135 = vector.broadcast %134 : f32 to vector<2x128xf32>
    %136 = arith.mulf %3, %135 : vector<2x128xf32>
    %c1_70 = arith.constant 1 : index
    %c8_71 = arith.constant 8 : index
    %137 = memref.load %arg3[%c1_70, %c8_71] : memref<5x16xf32, #tpu.memory_space<smem>>
    %138 = vector.broadcast %137 : f32 to vector<2x128xf32>
    %139 = arith.mulf %4, %138 : vector<2x128xf32>
    %140 = arith.addf %136, %139 : vector<2x128xf32>
    %c2_72 = arith.constant 2 : index
    %c8_73 = arith.constant 8 : index
    %141 = memref.load %arg3[%c2_72, %c8_73] : memref<5x16xf32, #tpu.memory_space<smem>>
    %142 = vector.broadcast %141 : f32 to vector<2x128xf32>
    %143 = arith.addf %140, %142 : vector<2x128xf32>
    %cst_74 = arith.constant 0.000000e+00 : f32
    %144 = vector.broadcast %cst_74 : f32 to vector<2x128xf32>
    %145 = arith.maximumf %143, %144 : vector<2x128xf32>
    %c3_75 = arith.constant 3 : index
    %c8_76 = arith.constant 8 : index
    %146 = memref.load %arg3[%c3_75, %c8_76] : memref<5x16xf32, #tpu.memory_space<smem>>
    %147 = vector.broadcast %146 : f32 to vector<2x128xf32>
    %148 = arith.mulf %145, %147 : vector<2x128xf32>
    %149 = arith.addf %133, %148 : vector<2x128xf32>
    %c0_77 = arith.constant 0 : index
    %c9 = arith.constant 9 : index
    %150 = memref.load %arg3[%c0_77, %c9] : memref<5x16xf32, #tpu.memory_space<smem>>
    %151 = vector.broadcast %150 : f32 to vector<2x128xf32>
    %152 = arith.mulf %3, %151 : vector<2x128xf32>
    %c1_78 = arith.constant 1 : index
    %c9_79 = arith.constant 9 : index
    %153 = memref.load %arg3[%c1_78, %c9_79] : memref<5x16xf32, #tpu.memory_space<smem>>
    %154 = vector.broadcast %153 : f32 to vector<2x128xf32>
    %155 = arith.mulf %4, %154 : vector<2x128xf32>
    %156 = arith.addf %152, %155 : vector<2x128xf32>
    %c2_80 = arith.constant 2 : index
    %c9_81 = arith.constant 9 : index
    %157 = memref.load %arg3[%c2_80, %c9_81] : memref<5x16xf32, #tpu.memory_space<smem>>
    %158 = vector.broadcast %157 : f32 to vector<2x128xf32>
    %159 = arith.addf %156, %158 : vector<2x128xf32>
    %cst_82 = arith.constant 0.000000e+00 : f32
    %160 = vector.broadcast %cst_82 : f32 to vector<2x128xf32>
    %161 = arith.maximumf %159, %160 : vector<2x128xf32>
    %c3_83 = arith.constant 3 : index
    %c9_84 = arith.constant 9 : index
    %162 = memref.load %arg3[%c3_83, %c9_84] : memref<5x16xf32, #tpu.memory_space<smem>>
    %163 = vector.broadcast %162 : f32 to vector<2x128xf32>
    %164 = arith.mulf %161, %163 : vector<2x128xf32>
    %165 = arith.addf %149, %164 : vector<2x128xf32>
    %c0_85 = arith.constant 0 : index
    %c10 = arith.constant 10 : index
    %166 = memref.load %arg3[%c0_85, %c10] : memref<5x16xf32, #tpu.memory_space<smem>>
    %167 = vector.broadcast %166 : f32 to vector<2x128xf32>
    %168 = arith.mulf %3, %167 : vector<2x128xf32>
    %c1_86 = arith.constant 1 : index
    %c10_87 = arith.constant 10 : index
    %169 = memref.load %arg3[%c1_86, %c10_87] : memref<5x16xf32, #tpu.memory_space<smem>>
    %170 = vector.broadcast %169 : f32 to vector<2x128xf32>
    %171 = arith.mulf %4, %170 : vector<2x128xf32>
    %172 = arith.addf %168, %171 : vector<2x128xf32>
    %c2_88 = arith.constant 2 : index
    %c10_89 = arith.constant 10 : index
    %173 = memref.load %arg3[%c2_88, %c10_89] : memref<5x16xf32, #tpu.memory_space<smem>>
    %174 = vector.broadcast %173 : f32 to vector<2x128xf32>
    %175 = arith.addf %172, %174 : vector<2x128xf32>
    %cst_90 = arith.constant 0.000000e+00 : f32
    %176 = vector.broadcast %cst_90 : f32 to vector<2x128xf32>
    %177 = arith.maximumf %175, %176 : vector<2x128xf32>
    %c3_91 = arith.constant 3 : index
    %c10_92 = arith.constant 10 : index
    %178 = memref.load %arg3[%c3_91, %c10_92] : memref<5x16xf32, #tpu.memory_space<smem>>
    %179 = vector.broadcast %178 : f32 to vector<2x128xf32>
    %180 = arith.mulf %177, %179 : vector<2x128xf32>
    %181 = arith.addf %165, %180 : vector<2x128xf32>
    %c0_93 = arith.constant 0 : index
    %c11 = arith.constant 11 : index
    %182 = memref.load %arg3[%c0_93, %c11] : memref<5x16xf32, #tpu.memory_space<smem>>
    %183 = vector.broadcast %182 : f32 to vector<2x128xf32>
    %184 = arith.mulf %3, %183 : vector<2x128xf32>
    %c1_94 = arith.constant 1 : index
    %c11_95 = arith.constant 11 : index
    %185 = memref.load %arg3[%c1_94, %c11_95] : memref<5x16xf32, #tpu.memory_space<smem>>
    %186 = vector.broadcast %185 : f32 to vector<2x128xf32>
    %187 = arith.mulf %4, %186 : vector<2x128xf32>
    %188 = arith.addf %184, %187 : vector<2x128xf32>
    %c2_96 = arith.constant 2 : index
    %c11_97 = arith.constant 11 : index
    %189 = memref.load %arg3[%c2_96, %c11_97] : memref<5x16xf32, #tpu.memory_space<smem>>
    %190 = vector.broadcast %189 : f32 to vector<2x128xf32>
    %191 = arith.addf %188, %190 : vector<2x128xf32>
    %cst_98 = arith.constant 0.000000e+00 : f32
    %192 = vector.broadcast %cst_98 : f32 to vector<2x128xf32>
    %193 = arith.maximumf %191, %192 : vector<2x128xf32>
    %c3_99 = arith.constant 3 : index
    %c11_100 = arith.constant 11 : index
    %194 = memref.load %arg3[%c3_99, %c11_100] : memref<5x16xf32, #tpu.memory_space<smem>>
    %195 = vector.broadcast %194 : f32 to vector<2x128xf32>
    %196 = arith.mulf %193, %195 : vector<2x128xf32>
    %197 = arith.addf %181, %196 : vector<2x128xf32>
    %c0_101 = arith.constant 0 : index
    %c12 = arith.constant 12 : index
    %198 = memref.load %arg3[%c0_101, %c12] : memref<5x16xf32, #tpu.memory_space<smem>>
    %199 = vector.broadcast %198 : f32 to vector<2x128xf32>
    %200 = arith.mulf %3, %199 : vector<2x128xf32>
    %c1_102 = arith.constant 1 : index
    %c12_103 = arith.constant 12 : index
    %201 = memref.load %arg3[%c1_102, %c12_103] : memref<5x16xf32, #tpu.memory_space<smem>>
    %202 = vector.broadcast %201 : f32 to vector<2x128xf32>
    %203 = arith.mulf %4, %202 : vector<2x128xf32>
    %204 = arith.addf %200, %203 : vector<2x128xf32>
    %c2_104 = arith.constant 2 : index
    %c12_105 = arith.constant 12 : index
    %205 = memref.load %arg3[%c2_104, %c12_105] : memref<5x16xf32, #tpu.memory_space<smem>>
    %206 = vector.broadcast %205 : f32 to vector<2x128xf32>
    %207 = arith.addf %204, %206 : vector<2x128xf32>
    %cst_106 = arith.constant 0.000000e+00 : f32
    %208 = vector.broadcast %cst_106 : f32 to vector<2x128xf32>
    %209 = arith.maximumf %207, %208 : vector<2x128xf32>
    %c3_107 = arith.constant 3 : index
    %c12_108 = arith.constant 12 : index
    %210 = memref.load %arg3[%c3_107, %c12_108] : memref<5x16xf32, #tpu.memory_space<smem>>
    %211 = vector.broadcast %210 : f32 to vector<2x128xf32>
    %212 = arith.mulf %209, %211 : vector<2x128xf32>
    %213 = arith.addf %197, %212 : vector<2x128xf32>
    %c0_109 = arith.constant 0 : index
    %c13 = arith.constant 13 : index
    %214 = memref.load %arg3[%c0_109, %c13] : memref<5x16xf32, #tpu.memory_space<smem>>
    %215 = vector.broadcast %214 : f32 to vector<2x128xf32>
    %216 = arith.mulf %3, %215 : vector<2x128xf32>
    %c1_110 = arith.constant 1 : index
    %c13_111 = arith.constant 13 : index
    %217 = memref.load %arg3[%c1_110, %c13_111] : memref<5x16xf32, #tpu.memory_space<smem>>
    %218 = vector.broadcast %217 : f32 to vector<2x128xf32>
    %219 = arith.mulf %4, %218 : vector<2x128xf32>
    %220 = arith.addf %216, %219 : vector<2x128xf32>
    %c2_112 = arith.constant 2 : index
    %c13_113 = arith.constant 13 : index
    %221 = memref.load %arg3[%c2_112, %c13_113] : memref<5x16xf32, #tpu.memory_space<smem>>
    %222 = vector.broadcast %221 : f32 to vector<2x128xf32>
    %223 = arith.addf %220, %222 : vector<2x128xf32>
    %cst_114 = arith.constant 0.000000e+00 : f32
    %224 = vector.broadcast %cst_114 : f32 to vector<2x128xf32>
    %225 = arith.maximumf %223, %224 : vector<2x128xf32>
    %c3_115 = arith.constant 3 : index
    %c13_116 = arith.constant 13 : index
    %226 = memref.load %arg3[%c3_115, %c13_116] : memref<5x16xf32, #tpu.memory_space<smem>>
    %227 = vector.broadcast %226 : f32 to vector<2x128xf32>
    %228 = arith.mulf %225, %227 : vector<2x128xf32>
    %229 = arith.addf %213, %228 : vector<2x128xf32>
    %c0_117 = arith.constant 0 : index
    %c14 = arith.constant 14 : index
    %230 = memref.load %arg3[%c0_117, %c14] : memref<5x16xf32, #tpu.memory_space<smem>>
    %231 = vector.broadcast %230 : f32 to vector<2x128xf32>
    %232 = arith.mulf %3, %231 : vector<2x128xf32>
    %c1_118 = arith.constant 1 : index
    %c14_119 = arith.constant 14 : index
    %233 = memref.load %arg3[%c1_118, %c14_119] : memref<5x16xf32, #tpu.memory_space<smem>>
    %234 = vector.broadcast %233 : f32 to vector<2x128xf32>
    %235 = arith.mulf %4, %234 : vector<2x128xf32>
    %236 = arith.addf %232, %235 : vector<2x128xf32>
    %c2_120 = arith.constant 2 : index
    %c14_121 = arith.constant 14 : index
    %237 = memref.load %arg3[%c2_120, %c14_121] : memref<5x16xf32, #tpu.memory_space<smem>>
    %238 = vector.broadcast %237 : f32 to vector<2x128xf32>
    %239 = arith.addf %236, %238 : vector<2x128xf32>
    %cst_122 = arith.constant 0.000000e+00 : f32
    %240 = vector.broadcast %cst_122 : f32 to vector<2x128xf32>
    %241 = arith.maximumf %239, %240 : vector<2x128xf32>
    %c3_123 = arith.constant 3 : index
    %c14_124 = arith.constant 14 : index
    %242 = memref.load %arg3[%c3_123, %c14_124] : memref<5x16xf32, #tpu.memory_space<smem>>
    %243 = vector.broadcast %242 : f32 to vector<2x128xf32>
    %244 = arith.mulf %241, %243 : vector<2x128xf32>
    %245 = arith.addf %229, %244 : vector<2x128xf32>
    %c0_125 = arith.constant 0 : index
    %c15 = arith.constant 15 : index
    %246 = memref.load %arg3[%c0_125, %c15] : memref<5x16xf32, #tpu.memory_space<smem>>
    %247 = vector.broadcast %246 : f32 to vector<2x128xf32>
    %248 = arith.mulf %3, %247 : vector<2x128xf32>
    %c1_126 = arith.constant 1 : index
    %c15_127 = arith.constant 15 : index
    %249 = memref.load %arg3[%c1_126, %c15_127] : memref<5x16xf32, #tpu.memory_space<smem>>
    %250 = vector.broadcast %249 : f32 to vector<2x128xf32>
    %251 = arith.mulf %4, %250 : vector<2x128xf32>
    %252 = arith.addf %248, %251 : vector<2x128xf32>
    %c2_128 = arith.constant 2 : index
    %c15_129 = arith.constant 15 : index
    %253 = memref.load %arg3[%c2_128, %c15_129] : memref<5x16xf32, #tpu.memory_space<smem>>
    %254 = vector.broadcast %253 : f32 to vector<2x128xf32>
    %255 = arith.addf %252, %254 : vector<2x128xf32>
    %cst_130 = arith.constant 0.000000e+00 : f32
    %256 = vector.broadcast %cst_130 : f32 to vector<2x128xf32>
    %257 = arith.maximumf %255, %256 : vector<2x128xf32>
    %c3_131 = arith.constant 3 : index
    %c15_132 = arith.constant 15 : index
    %258 = memref.load %arg3[%c3_131, %c15_132] : memref<5x16xf32, #tpu.memory_space<smem>>
    %259 = vector.broadcast %258 : f32 to vector<2x128xf32>
    %260 = arith.mulf %257, %259 : vector<2x128xf32>
    %261 = arith.addf %245, %260 : vector<2x128xf32>
    %c4_133 = arith.constant 4 : index
    %c0_134 = arith.constant 0 : index
    %262 = memref.load %arg3[%c4_133, %c0_134] : memref<5x16xf32, #tpu.memory_space<smem>>
    %263 = vector.broadcast %262 : f32 to vector<2x128xf32>
    %264 = arith.addf %261, %263 : vector<2x128xf32>
    %c0_135 = arith.constant 0 : index
    %c0_136 = arith.constant 0 : index
    %265 = vector.load %arg4[%c0_135, %c0_136] : memref<2x128xf32, #tpu.memory_space<vmem>>, vector<2x128xf32>
    tpu.vector_store %arg4[%c0_135, %c0_136], %264 {strides = array<i32>} : memref<2x128xf32, #tpu.memory_space<vmem>>, vector<2x128xf32>,
    return
  }
  func.func @transform_0(%arg0: i32) -> (i32, i32) {
    %c0_i32 = arith.constant 0 : i32
    %c0_i32_0 = arith.constant 0 : i32
    return %arg0, %c0_i32 : i32, i32
  }
  func.func @transform_1(%arg0: i32) -> (i32, i32) {
    %c0_i32 = arith.constant 0 : i32
    %c0_i32_0 = arith.constant 0 : i32
    %c0_i32_1 = arith.constant 0 : i32
    return %c0_i32, %c0_i32_0 : i32, i32
  }
  func.func @transform_2(%arg0: i32) -> (i32, i32) {
    %c0_i32 = arith.constant 0 : i32
    %c0_i32_0 = arith.constant 0 : i32
    %c0_i32_1 = arith.constant 0 : i32
    return %c0_i32, %c0_i32_0 : i32, i32
  }
  func.func @transform_3(%arg0: i32) -> (i32, i32) {
    %c0_i32 = arith.constant 0 : i32
    %c0_i32_0 = arith.constant 0 : i32
    return %arg0, %c0_i32 : i32, i32
  }
}

</mosaic_0001>

<bundles_post_ra>
// kernel: simple_nn_forward.1
= control target key start
LH: loop header
LB: loop body
LE: loop exit
PB: predicated region body
PF: predicated region fallthrough
CT: control target
= control target key end

     0   :  { %s1037_s0 = inlined_call_operand.vmem [shape: f32[2,256], index: 0, kind: input, shape index: {}]   ;;  %s1038_s1 = inlined_call_operand.vmem [shape: f32[256,256], index: 1, kind: input, shape index: {}]   ;;  %s1039_s2 = inlined_call_operand.vmem [shape: f32[5,16], index: 2, kind: input, shape index: {}]   ;;  %s1040_s3 = inlined_call_operand.hbm [shape: f32[2,128], index: 3, kind: output, shape index: {}]  }
   0x1   :  { %1054 = sst [smem:[#allocation22_spill]] %s1040_s3 }
   0x2   :  { %8 = vsyncpa [#allocation4], 0 }
   0x3   :  { %9 = vsyncpa [#allocation3], 0  ;;  %s19_s14 = sshll.u32 %s1039_s2, 4  ;;  %s546_s15 = smov [#allocation2]   ;;  %s20_s14 = int_to_ptr.vmem [resolvable:$true] %s19_s14 }
   0x4   :  { %22 = dma.vmem_to_smem %s20_s14, 128, %s546_s15, [#allocation4]  }
   0x5   :  { %542 = dma.done.wait [#allocation4], 128  }
   0x6   :  { %543 = vsyncadd [#allocation4], 4294967168 }
   0x7   :  { %27 = sfence }
   0x8   :  { %v60_v0 = vld [vmem:[%s1038_s1 + $0xf8] sm:$0xff]  ;;  %v58_v2 = vld [vmem:[%s1038_s1 + $0xe8] sm:$0xff]  ;;  %v59_v6 = vld [vmem:[%s1038_s1 + $0xf0] sm:$0xff]  ;;  %s766_s4 = sld [smem:[#allocation2]] }
   0x9   :  { %v92_v1 = vld [vmem:[%s1038_s1 + $0x1f8] sm:$0xff]  ;;  %139 = vmatpush.msra.mxu2 %v60_v0  ;;  %v90_v3 = vld [vmem:[%s1038_s1 + $0x1e8] sm:$0xff]  ;;  %v91_v7 = vld [vmem:[%s1038_s1 + $0x1f0] sm:$0xff]  ;;  %99 = vmatpush.msra.mxu0 %v59_v6  ;;  %s768_s5 = sld [smem:[#allocation2 + $0x80]] }
   0xa   :  { %159 = vmatpush.msra.mxu3 %v92_v1  ;;  %v56_v4 = vld [vmem:[%s1038_s1 + $0xd8] sm:$0xff]  ;;  %v57_v8 = vld [vmem:[%s1038_s1 + $0xe0] sm:$0xff]  ;;  %119 = vmatpush.msra.mxu1 %v91_v7  ;;  %v54_v10 = vld [vmem:[%s1038_s1 + $0xc8] sm:$0xff]  ;;  %s770_s6 = sld [smem:[#allocation2 + $0x1]] }
   0xb   :  { %v88_v5 = vld [vmem:[%s1038_s1 + $0x1d8] sm:$0xff]  ;;  %140 = vmatpush.msra.mxu2 %v58_v2  ;;  %v89_v9 = vld [vmem:[%s1038_s1 + $0x1e0] sm:$0xff]  ;;  %v86_v11 = vld [vmem:[%s1038_s1 + $0x1c8] sm:$0xff]  ;;  %100 = vmatpush.msra.mxu0 %v57_v8  ;;  %s772_s7 = sld [smem:[#allocation2 + $0x81]] }
   0xc   :  { %160 = vmatpush.msra.mxu3 %v90_v3  ;;  %v55_v12 = vld [vmem:[%s1038_s1 + $0xd0] sm:$0xff]  ;;  %120 = vmatpush.msra.mxu1 %v89_v9  ;;  %v52_v14 = vld [vmem:[%s1038_s1 + $0xb8] sm:$0xff]  ;;  %v53_v16 = vld [vmem:[%s1038_s1 + $0xc0] sm:$0xff]  ;;  %s774_s8 = sld [smem:[#allocation2 + $0x100]] }
   0xd   :  { %141 = vmatpush.msra.mxu2 %v56_v4  ;;  %v87_v13 = vld [vmem:[%s1038_s1 + $0x1d0] sm:$0xff]  ;;  %v84_v15 = vld [vmem:[%s1038_s1 + $0x1b8] sm:$0xff]  ;;  %v85_v17 = vld [vmem:[%s1038_s1 + $0x1c0] sm:$0xff]  ;;  %101 = vmatpush.msra.mxu0 %v55_v12  ;;  %s776_s9 = sld [smem:[#allocation2 + $0x101]] }
   0xe   :  { %161 = vmatpush.msra.mxu3 %v88_v5  ;;  %121 = vmatpush.msra.mxu1 %v87_v13  ;;  %v50_v18 = vld [vmem:[%s1038_s1 + $0xa8] sm:$0xff]  ;;  %v51_v20 = vld [vmem:[%s1038_s1 + $0xb0] sm:$0xff]  ;;  %v48_v22 = vld [vmem:[%s1038_s1 + $0x98] sm:$0xff]  ;;  %s778_s10 = sld [smem:[#allocation2 + $0x2]]  ;;  %v180_v3 = vstv %s766_s4 }
   0xf   :  { %142 = vmatpush.msra.mxu2 %v54_v10  ;;  %v82_v19 = vld [vmem:[%s1038_s1 + $0x1a8] sm:$0xff]  ;;  %v83_v21 = vld [vmem:[%s1038_s1 + $0x1b0] sm:$0xff]  ;;  %102 = vmatpush.msra.mxu0 %v53_v16  ;;  %v80_v23 = vld [vmem:[%s1038_s1 + $0x198] sm:$0xff]  ;;  %1055 = sst [smem:[#allocation8_spill]] %s768_s5  ;;  %v183_v4 = vstv %s768_s5 }
  0x10   :  { %162 = vmatpush.msra.mxu3 %v86_v11  ;;  %122 = vmatpush.msra.mxu1 %v85_v17  ;;  %v49_v24 = vld [vmem:[%s1038_s1 + $0xa0] sm:$0xff]  ;;  %v46_v26 = vld [vmem:[%s1038_s1 + $0x88] sm:$0xff]  ;;  %v47_v28 = vld [vmem:[%s1038_s1 + $0x90] sm:$0xff]  ;;  %s782_s11 = sld [smem:[#allocation2 + $0x180]]  ;;  %v195_v5 = vstv %s770_s6 }
  0x11   :  { %143 = vmatpush.msra.mxu2 %v52_v14  ;;  %v81_v25 = vld [vmem:[%s1038_s1 + $0x1a0] sm:$0xff]  ;;  %103 = vmatpush.msra.mxu0 %v51_v20  ;;  %v78_v27 = vld [vmem:[%s1038_s1 + $0x188] sm:$0xff]  ;;  %v79_v29 = vld [vmem:[%s1038_s1 + $0x190] sm:$0xff]  ;;  %s784_s12 = sld [smem:[#allocation2 + $0x181]]  ;;  %v198_v6 = vstv %s772_s7 }
  0x12   :  { %163 = vmatpush.msra.mxu3 %v84_v15  ;;  %123 = vmatpush.msra.mxu1 %v83_v21  ;;  %v44_v30 = vld [vmem:[%s1038_s1 + $0x78] sm:$0xff]  ;;  %v45_v32 = vld [vmem:[%s1038_s1 + $0x80] sm:$0xff]  ;;  %v42_v34 = vld [vmem:[%s1038_s1 + $0x68] sm:$0xff]  ;;  %s786_s13 = sld [smem:[#allocation2 + $0x102]]  ;;  %v187_v16 = vstv %s774_s8 }
  0x13   :  { %144 = vmatpush.msra.mxu2 %v50_v18  ;;  %104 = vmatpush.msra.mxu0 %v49_v24  ;;  %v76_v31 = vld [vmem:[%s1038_s1 + $0x178] sm:$0xff]  ;;  %v77_v33 = vld [vmem:[%s1038_s1 + $0x180] sm:$0xff]  ;;  %v74_v35 = vld [vmem:[%s1038_s1 + $0x168] sm:$0xff]  ;;  %s788_s14 = sld [smem:[#allocation2 + $0x182]]  ;;  %v202_v20 = vstv %s776_s9 }
  0x14   :  { %164 = vmatpush.msra.mxu3 %v82_v19  ;;  %124 = vmatpush.msra.mxu1 %v81_v25  ;;  %v43_v36 = vld [vmem:[%s1038_s1 + $0x70] sm:$0xff]  ;;  %v40_v38 = vld [vmem:[%s1038_s1 + $0x58] sm:$0xff]  ;;  %v41_v40 = vld [vmem:[%s1038_s1 + $0x60] sm:$0xff]  ;;  %s790_s15 = sld [smem:[#allocation2 + $0x3]]  ;;  %v210_v7 = vstv %s778_s10 }
  0x15   :  { %145 = vmatpush.msra.mxu2 %v48_v22  ;;  %105 = vmatpush.msra.mxu0 %v47_v28  ;;  %v75_v37 = vld [vmem:[%s1038_s1 + $0x170] sm:$0xff]  ;;  %v72_v39 = vld [vmem:[%s1038_s1 + $0x158] sm:$0xff]  ;;  %v73_v41 = vld [vmem:[%s1038_s1 + $0x160] sm:$0xff]  ;;  %s792_s16 = sld [smem:[#allocation2 + $0x83]] }
  0x16   :  { %165 = vmatpush.msra.mxu3 %v80_v23  ;;  %125 = vmatpush.msra.mxu1 %v79_v29  ;;  %v28_v42 = vld [vmem:[%s1037_s0] sm:$0xf]  ;;  %v38_v43 = vld [vmem:[%s1038_s1 + $0x48] sm:$0xff]  ;;  %v39_v45 = vld [vmem:[%s1038_s1 + $0x50] sm:$0xff]  ;;  %s794_s17 = sld [smem:[#allocation2 + $0x103]]  ;;  %v191_v24 = vstv %s782_s11 }
  0x17   :  { %146 = vmatpush.msra.mxu2 %v46_v26  ;;  %106 = vmatpush.msra.mxu0 %v45_v32  ;;  %v70_v44 = vld [vmem:[%s1038_s1 + $0x148] sm:$0xff]  ;;  %94 = vst [vmem:[#allocation1] ss:$4 sm:$0xff] %v28_v42  ;;  %v71_v46 = vld [vmem:[%s1038_s1 + $0x150] sm:$0xff]  ;;  %v36_v47 = vld [vmem:[%s1038_s1 + $0x38] sm:$0xff]  ;;  %1056 = sst [smem:[#allocation9_spill]] %s784_s12 }
  0x18   :  { %166 = vmatpush.msra.mxu3 %v78_v27  ;;  %126 = vmatpush.msra.mxu1 %v77_v33  ;;  %v68_v48 = vld [vmem:[%s1038_s1 + $0x138] sm:$0xff]  ;;  %v37_v49 = vld [vmem:[%s1038_s1 + $0x40] sm:$0xff]  ;;  %v34_v51 = vld [vmem:[%s1038_s1 + $0x28] sm:$0xff]  ;;  %s796_s18 = sld [smem:[#allocation2 + $0x183]]  ;;  %v217_v21 = vstv %s786_s13 }
  0x19   :  { %147 = vmatpush.msra.mxu2 %v44_v30  ;;  %107 = vmatpush.msra.mxu0 %v43_v36  ;;  %v69_v50 = vld [vmem:[%s1038_s1 + $0x140] sm:$0xff]  ;;  %v66_v52 = vld [vmem:[%s1038_s1 + $0x128] sm:$0xff]  ;;  %v35_v53 = vld [vmem:[%s1038_s1 + $0x30] sm:$0xff]  ;;  %1057 = sst [smem:[#allocation10_spill]] %s788_s14 }
  0x1a   :  { %167 = vmatpush.msra.mxu3 %v76_v31  ;;  %127 = vmatpush.msra.mxu1 %v75_v37  ;;  %v67_v54 = vld [vmem:[%s1038_s1 + $0x130] sm:$0xff]  ;;  %v32_v55 = vld [vmem:[%s1038_s1 + $0x18] sm:$0xff]  ;;  %v33_v57 = vld [vmem:[%s1038_s1 + $0x20] sm:$0xff]  ;;  %s798_s19 = sld [smem:[#allocation2 + $0x4]]  ;;  %v225_v9 = vstv %s790_s15 }
  0x1b   :  { %148 = vmatpush.msra.mxu2 %v42_v34  ;;  %108 = vmatpush.msra.mxu0 %v41_v40  ;;  %v64_v56 = vld [vmem:[%s1038_s1 + $0x118] sm:$0xff]  ;;  %v65_v58 = vld [vmem:[%s1038_s1 + $0x120] sm:$0xff]  ;;  %v30_v59 = vld [vmem:[%s1038_s1 + $0x8] sm:$0xff]  ;;  %s800_s20 = sld [smem:[#allocation2 + $0x84]]  ;;  %v228_v10 = vstv %s792_s16 }
  0x1c   :  { %168 = vmatpush.msra.mxu3 %v74_v35  ;;  %128 = vmatpush.msra.mxu1 %v73_v41  ;;  %v62_v60 = vld [vmem:[%s1038_s1 + $0x108] sm:$0xff]  ;;  %v31_v63 = vld [vmem:[%s1038_s1 + $0x10] sm:$0xff]  ;;  %v29_v1 = vld [vmem:[%s1038_s1] sm:$0xff]  ;;  %s802_s21 = sld [smem:[#allocation2 + $0x104]]  ;;  %v232_v22 = vstv %s794_s17 }
  0x1d   :  { %149 = vmatpush.msra.mxu2 %v40_v38  ;;  %109 = vmatpush.msra.mxu0 %v39_v45  ;;  %v63_v0 = vld [vmem:[%s1038_s1 + $0x110] sm:$0xff]  ;;  %v61_v2 = vld [vmem:[%s1038_s1 + $0x100] sm:$0xff]  ;;  %s780_s1 = sld [smem:[#allocation2 + $0x82]] }
  0x1e   :  { %169 = vmatpush.msra.mxu3 %v72_v39  ;;  %129 = vmatpush.msra.mxu1 %v71_v46  ;;  %v95_v61 = vld.sshfl [vmem:[#allocation1] sm:$0xff pattern:$0x73625140]  ;;  %v96_v62 = vld.sshfl [vmem:[#allocation1 + $0x8] sm:$0xff pattern:$0x73625140] }
  0x1f   :  { %150 = vmatpush.msra.mxu2 %v38_v43  ;;  %110 = vmatpush.msra.mxu0 %v37_v49  ;;  %1058 = sst [smem:[#allocation11_spill]] %s796_s18 }
  0x20   :  { %170 = vmatpush.msra.mxu3 %v70_v44  ;;  %130 = vmatpush.msra.mxu1 %v69_v50  ;;  %s804_s2 = sld [smem:[#allocation2 + $0x184]]  ;;  %v240_v11 = vstv %s798_s19 }
  0x21   :  { %151 = vmatpush.msra.mxu2 %v36_v47  ;;  %111 = vmatpush.msra.mxu0 %v35_v53  ;;  %s806_s22 = sld [smem:[#allocation2 + $0x5]]  ;;  %v243_v12 = vstv %s800_s20 }
  0x22   :  { %171 = vmatpush.msra.mxu3 %v68_v48  ;;  %131 = vmatpush.msra.mxu1 %v67_v54  ;;  %s808_s23 = sld [smem:[#allocation2 + $0x85]]  ;;  %v247_v25 = vstv %s802_s21 }
  0x23   :  { %152 = vmatpush.msra.mxu2 %v34_v51  ;;  %112 = vmatpush.msra.mxu0 %v33_v57  ;;  %s810_s24 = sld [smem:[#allocation2 + $0x105]]  ;;  %v213_v8 = vstv %s780_s1 }
  0x24   :  { %172 = vmatpush.msra.mxu3 %v66_v52  ;;  %132 = vmatpush.msra.mxu1 %v65_v58  ;;  %s812_s0 = sld [smem:[#allocation2 + $0x185]] }
  0x25   :  { %153 = vmatpush.msra.mxu2 %v32_v55  ;;  %113 = vmatpush.msra.mxu0 %v31_v63  ;;  %s814_s25 = sld [smem:[#allocation2 + $0x6]] }
  0x26   :  { %173 = vmatpush.msra.mxu3 %v64_v56  ;;  %133 = vmatpush.msra.mxu1 %v63_v0  ;;  %1059 = sst [smem:[#allocation12_spill]] %s804_s2 }
  0x27   :  { %154 = vmatpush.msra.mxu2 %v30_v59  ;;  %114 = vmatpush.msra.mxu0 %v29_v1  ;;  %s816_s26 = sld [smem:[#allocation2 + $0x86]]  ;;  %v255_v13 = vstv %s806_s22 }
  0x28   :  { %174 = vmatpush.msra.mxu3 %v62_v60  ;;  %155 = vmatmul.f32.vlgmr.msra.gmra.mxu2 %v95_v61  ;;  %s818_s27 = sld [smem:[#allocation2 + $0x106]]  ;;  %v258_v14 = vstv %s808_s23 }
  0x29   :  { %175 = vmatmul.f32.vlgmr.msra.gmra.mxu3 %v96_v62  ;;  %134 = vmatpush.msra.mxu1 %v61_v2  ;;  %s820_s28 = sld [smem:[#allocation2 + $0x186]]  ;;  %v262_v26 = vstv %s810_s24 }
  0x2a   :  { %115 = vmatmul.f32.vlgmr.msra.gmra.mxu0 %v95_v61  ;;  %135 = vmatmul.f32.vlgmr.msra.gmra.mxu1 %v96_v62  ;;  %1060 = sst [smem:[#allocation13_spill]] %s812_s0 }
  0x2b   :  { %s822_s29 = sld [smem:[#allocation2 + $0x7]]  ;;  %v270_v15 = vstv %s814_s25 }
  0x2c   :  { %s824_s30 = sld [smem:[#allocation2 + $0x87]] }
  0x2d   :  { %s826_s3 = sld [smem:[#allocation2 + $0x107]]  ;;  %v273_v17 = vstv %s816_s26 }
  0x2e   :  { %1061 = sst [smem:[#allocation14_spill]] %s818_s27 }
  0x2f   :  { %1062 = sst [smem:[#allocation15_spill]] %s820_s28 }
  0x30   :  { %s828_s0 = sld [smem:[#allocation2 + $0x187]] }
  0x31   :  { %s830_s2 = sld [smem:[#allocation2 + $0x8]]  ;;  %v285_v18 = vstv %s822_s29 }
  0x32   :  { %s832_s18 = sld [smem:[#allocation2 + $0x88]]  ;;  %v288_v19 = vstv %s824_s30 }
  0x33   :  { %1063 = sst [smem:[#allocation16_spill]] %s826_s3 }
  0x34   :  { %s834_s14 = sld [smem:[#allocation2 + $0x108]] }
  0x35   :  { %s836_s28 = sld [smem:[#allocation2 + $0x9]] }
  0x36   :  { %1064 = sst [smem:[#allocation17_spill]] %s828_s0 }
  0x37   :  { %s838_s12 = sld [smem:[#allocation2 + $0x89]]  ;;  %v300_v23 = vstv %s830_s2 }
  0x38   :  { %1065 = sst [smem:[#allocation18_spill]] %s832_s18 }
  0x39   :  { %s840_s27 = sld [smem:[#allocation2 + $0xa]] }
  0x3a   :  { %1066 = sst [smem:[#allocation19_spill]] %s834_s14 }
  0x3b   :  { %s842_s3 = sld [smem:[#allocation2 + $0x8a]]  ;;  %v315_v39 = vstv %s836_s28 }
  0x3c   :  { %s844_s0 = sld [smem:[#allocation2 + $0xb]] }
  0x3d   :  { %s847_s18 = sld [smem:[#allocation2 + $0x8b]]  ;;  %v318_v40 = vstv %s838_s12 }
  0x3e   :  { %s853_s14 = sld [smem:[#allocation2 + $0xc]] }
  0x3f   :  { %s859_s4 = sld [smem:[#allocation2 + $0x8c]]  ;;  %v330_v41 = vstv %s840_s27 }
  0x40   :  { %s1069_s6 = sld [smem:[#allocation14_spill]] }
  0x41   :  { %s1070_s7 = sld [smem:[#allocation9_spill]]  ;;  %v333_v43 = vstv %s842_s3 }
  0x42   :  { %s1071_s10 = sld [smem:[#allocation10_spill]]  ;;  %v345_v44 = vstv %s844_s0 }
  0x43   :  { %s1072_s5 = sld [smem:[#allocation11_spill]]  ;;  %v348_v45 = vstv %s847_s18 }
  0x44   :  { %1067 = sst [smem:[#allocation20_spill]] %s853_s14 }
  0x45   :  { %1068 = sst [smem:[#allocation21_spill]] %s859_s4 }
  0x46   :  { %s865_s14 = sld [smem:[#allocation2 + $0xd]]  ;;  %v277_v27 = vstv %s1069_s6 }
  0x47   :  { %s1073_s1 = sld [smem:[#allocation16_spill]]  ;;  %v206_v28 = vstv %s1070_s7 }
  0x48   :  { %s1074_s15 = sld [smem:[#allocation12_spill]]  ;;  %v221_v29 = vstv %s1071_s10  ;;  %s547_s10 = smov [#allocation5]  }
  0x49   :  { %s1075_s16 = sld [smem:[#allocation13_spill]]  ;;  %v236_v30 = vstv %s1072_s5 }
  0x4a   :  { %s1076_s19 = sld [smem:[#allocation15_spill]] }
  0x4b   :  { %s1077_s4 = sld [smem:[#allocation18_spill]] }
  0x4c   :  { %s1078_s20 = sld [smem:[#allocation17_spill]]  ;;  %v375_v51 = vstv %s865_s14 }
  0x4d   :  { %v292_v31 = vstv %s1073_s1  ;;  %s1079_s9 = sld [smem:[#allocation19_spill]]  ;;  %s428_s1 = sshll.u32 %s547_s10, 4  ;;  %s429_s1 = int_to_ptr.vmem [resolvable:$true] %s428_s1 }
  0x4e   :  { %v251_v32 = vstv %s1074_s15  ;;  %s1080_s13 = sld [smem:[#allocation20_spill]] }
  0x4f   :  { %v266_v33 = vstv %s1075_s16  ;;  %s1081_s17 = sld [smem:[#allocation21_spill]] }
  0x50   :  { %v281_v34 = vstv %s1076_s19  ;;  %s893_s21 = sld [smem:[#allocation2 + $0x109]] }
  0x51   :  { %v303_v35 = vstv %s1077_s4  ;;  %s899_s23 = sld [smem:[#allocation2 + $0x10a]] }
  0x52   :  { %v296_v38 = vstv %s1078_s20  ;;  %s909_s24 = sld [smem:[#allocation2 + $0x8d]] }
  0x53   :  { %v307_v48 = vstv %s1079_s9  ;;  %s915_s25 = sld [smem:[#allocation2 + $0xe]] }
  0x54   :  { %v360_v49 = vstv %s1080_s13  ;;  %s923_s26 = sld [smem:[#allocation2 + $0x10b]] }
  0x55   :  { %v363_v50 = vstv %s1081_s17  ;;  %s933_s8 = sld [smem:[#allocation2 + $0x8e]] }
  0x56   :  { %s938_s29 = sld [smem:[#allocation2 + $0xf]] }
  0x57   :  { %s949_s30 = sld [smem:[#allocation2 + $0x8f]] }
  0x58   :  { %s957_s11 = sld [smem:[#allocation2 + $0x188]] }
  0x59   :  { %s973_s2 = sld [smem:[#allocation2 + $0x10c]] }
  0x5a   :  { %s975_s28 = sld [smem:[#allocation2 + $0x189]] }
  0x5b   :  { %s989_s3 = sld [smem:[#allocation2 + $0x10d]] }
  0x5c   :  { %s995_s5 = sld [smem:[#allocation2 + $0x18a]] }
  0x5d   :  { %s1000_s12 = sld [smem:[#allocation2 + $0x10e]] }
  0x5e   :  { %s1003_s18 = sld [smem:[#allocation2 + $0x18b]] }
  0x5f   :  { %s1012_s0 = sld [smem:[#allocation2 + $0x10f]] }
  0x60   :  { %s1020_s14 = sld [smem:[#allocation2 + $0x18c]] }
  0x61   :  { %s1025_s27 = sld [smem:[#allocation2 + $0x18d]] }
  0x62   :  { %s498_s4 = sld [smem:[#allocation2 + $0x18e]] }
  0x63   :  { %s502_s6 = sld [smem:[#allocation2 + $0x18f]] }
  0x64   :  { %s503_s7 = sld [smem:[#allocation2 + $0x200]] }
  0x65   :  { %s1083_s19 = sld [smem:[#allocation22_spill]] }
  0x6b   :  { %s430_s20 = sshll.u32 %s1083_s19, 4  ;;  %s431_s20 = int_to_ptr.hbm [resolvable:$true] %s430_s20 }
  0xa7   :  { %v116_v36 = vpop.f32.mrf.mxu0  ;;  %v136_v37 = vpop.f32.mrf.mxu1 }
  0xa8   :  { %v891_v42 = vadd.f32 %v136_v37, %v116_v36 }
  0xaa   :  { %v181_v53 = vmul.f32 %v180_v3, %v891_v42  ;;  %v196_v54 = vmul.f32 %v195_v5, %v891_v42  ;;  %v211_v55 = vmul.f32 %v210_v7, %v891_v42  ;;  %v226_v56 = vmul.f32 %v225_v9, %v891_v42 }
  0xab   :  { %v156_v46 = vpop.f32.mrf.mxu2  ;;  %v241_v57 = vmul.f32 %v240_v11, %v891_v42  ;;  %v256_v58 = vmul.f32 %v255_v13, %v891_v42  ;;  %v271_v59 = vmul.f32 %v270_v15, %v891_v42  ;;  %v286_v3 = vmul.f32 %v285_v18, %v891_v42 }
  0xac   :  { %v176_v47 = vpop.f32.mrf.mxu3 }
  0xad   :  { %v904_v52 = vadd.f32 %v176_v47, %v156_v46 }
  0xaf   :  { %v184_v60 = vmul.f32 %v183_v4, %v904_v52  ;;  %v199_v61 = vmul.f32 %v198_v6, %v904_v52  ;;  %v214_v62 = vmul.f32 %v213_v8, %v904_v52  ;;  %v229_v63 = vmul.f32 %v228_v10, %v904_v52 }
  0xb0   :  { %v244_v0 = vmul.f32 %v243_v12, %v904_v52  ;;  %v259_v1 = vmul.f32 %v258_v14, %v904_v52  ;;  %v274_v2 = vmul.f32 %v273_v17, %v904_v52  ;;  %v289_v10 = vmul.f32 %v288_v19, %v904_v52 }
  0xb1   :  { %v185_v5 = vadd.f32 %v184_v60, %v181_v53  ;;  %v200_v7 = vadd.f32 %v199_v61, %v196_v54  ;;  %v215_v4 = vadd.f32 %v214_v62, %v211_v55  ;;  %v230_v9 = vadd.f32 %v229_v63, %v226_v56 }
  0xb2   :  { %v245_v6 = vadd.f32 %v244_v0, %v241_v57  ;;  %v260_v11 = vadd.f32 %v259_v1, %v256_v58  ;;  %v275_v8 = vadd.f32 %v274_v2, %v271_v59  ;;  %v290_v37 = vadd.f32 %v289_v10, %v286_v3 }
  0xb3   :  { %v188_v12 = vadd.f32 %v187_v16, %v185_v5  ;;  %v203_v13 = vadd.f32 %v202_v20, %v200_v7  ;;  %v218_v14 = vadd.f32 %v217_v21, %v215_v4  ;;  %v233_v15 = vadd.f32 %v232_v22, %v230_v9 }
  0xb4   :  { %v248_v17 = vadd.f32 %v247_v25, %v245_v6  ;;  %v263_v18 = vadd.f32 %v262_v26, %v260_v11  ;;  %v278_v36 = vadd.f32 %v277_v27, %v275_v8  ;;  %v378_v19 = vstv %s909_s24 }
  0xb5   :  { %v189_v46 = vmax.f32 %v188_v12, 0.0  ;;  %v204_v47 = vmax.f32 %v203_v13, 0.0  ;;  %v219_v53 = vmax.f32 %v218_v14, 0.0  ;;  %v234_v16 = vmax.f32 %v233_v15, 0.0 }
  0xb6   :  { %v322_v20 = vstv %s893_s21  ;;  %v337_v21 = vstv %s899_s23  ;;  %v390_v22 = vstv %s915_s25  ;;  %v249_v27 = vmax.f32 %v248_v17, 0.0 }
  0xb7   :  { %v192_v25 = vmul.f32 %v191_v24, %v189_v46  ;;  %v207_v26 = vmul.f32 %v206_v28, %v204_v47  ;;  %v352_v54 = vstv %s923_s26  ;;  %v222_v55 = vmul.f32 %v221_v29, %v219_v53 }
  0xb8   :  { %v264_v56 = vmax.f32 %v263_v18, 0.0  ;;  %v279_v57 = vmax.f32 %v278_v36, 0.0  ;;  %v293_v58 = vadd.f32 %v292_v31, %v290_v37  ;;  %v301_v24 = vmul.f32 %v300_v23, %v891_v42 }
  0xb9   :  { %v208_v59 = vadd.f32 %v207_v26, %v192_v25  ;;  %v304_v28 = vmul.f32 %v303_v35, %v904_v52  ;;  %v316_v29 = vmul.f32 %v315_v39, %v891_v42  ;;  %v237_v60 = vmul.f32 %v236_v30, %v234_v16 }
  0xba   :  { %v319_v31 = vmul.f32 %v318_v40, %v904_v52  ;;  %v331_v23 = vmul.f32 %v330_v41, %v891_v42  ;;  %v334_v61 = vmul.f32 %v333_v43, %v904_v52  ;;  %v346_v30 = vmul.f32 %v345_v44, %v891_v42 }
  0xbb   :  { %v223_v35 = vadd.f32 %v222_v55, %v208_v59  ;;  %v305_v62 = vadd.f32 %v304_v28, %v301_v24  ;;  %v349_v39 = vmul.f32 %v348_v45, %v904_v52  ;;  %v361_v43 = vmul.f32 %v360_v49, %v891_v42 }
  0xbc   :  { %v320_v40 = vadd.f32 %v319_v31, %v316_v29  ;;  %v335_v41 = vadd.f32 %v334_v61, %v331_v23  ;;  %v364_v63 = vmul.f32 %v363_v50, %v904_v52  ;;  %v252_v1 = vmul.f32 %v251_v32, %v249_v27 }
  0xbd   :  { %v238_v0 = vadd.f32 %v237_v60, %v223_v35  ;;  %v308_v44 = vadd.f32 %v307_v48, %v305_v62  ;;  %v393_v45 = vstv %s933_s8  ;;  %v267_v2 = vmul.f32 %v266_v33, %v264_v56 }
  0xbe   :  { %v294_v3 = vmax.f32 %v293_v58, 0.0  ;;  %v350_v49 = vadd.f32 %v349_v39, %v346_v30  ;;  %v405_v50 = vstv %s938_s29  ;;  %v323_v7 = vadd.f32 %v322_v20, %v320_v40 }
  0xbf   :  { %v253_v5 = vadd.f32 %v252_v1, %v238_v0  ;;  %v376_v32 = vmul.f32 %v375_v51, %v891_v42  ;;  %v379_v48 = vmul.f32 %v378_v19, %v904_v52  ;;  %v282_v4 = vmul.f32 %v281_v34, %v279_v57 }
  0xc0   :  { %v338_v33 = vadd.f32 %v337_v21, %v335_v41  ;;  %v365_v9 = vadd.f32 %v364_v63, %v361_v43  ;;  %v408_v6 = vstv %s949_s30  ;;  %v309_v8 = vmax.f32 %v308_v44, 0.0 }
  0xc1   :  { %v268_v11 = vadd.f32 %v267_v2, %v253_v5  ;;  %v391_v10 = vmul.f32 %v390_v22, %v891_v42  ;;  %v394_v12 = vmul.f32 %v393_v45, %v904_v52  ;;  %v297_v13 = vmul.f32 %v296_v38, %v294_v3 }
  0xc2   :  { %v311_v51 = vstv %s957_s11  ;;  %v353_v14 = vadd.f32 %v352_v54, %v350_v49  ;;  %v367_v15 = vstv %s973_s2  ;;  %v324_v17 = vmax.f32 %v323_v7, 0.0 }
  0xc3   :  { %v283_v34 = vadd.f32 %v282_v4, %v268_v11  ;;  %v380_v18 = vadd.f32 %v379_v48, %v376_v32  ;;  %v406_v36 = vmul.f32 %v405_v50, %v891_v42  ;;  %v326_v37 = vstv %s975_s28 }
  0xc4   :  { %v339_v46 = vmax.f32 %v338_v33, 0.0  ;;  %v382_v47 = vstv %s989_s3  ;;  %v409_v38 = vmul.f32 %v408_v6, %v904_v52  ;;  %v312_v19 = vmul.f32 %v311_v51, %v309_v8 }
  0xc5   :  { %v298_v53 = vadd.f32 %v297_v13, %v283_v34  ;;  %v368_v16 = vadd.f32 %v367_v15, %v365_v9  ;;  %v395_v20 = vadd.f32 %v394_v12, %v391_v10  ;;  %v341_v21 = vstv %s995_s5 }
  0xc6   :  { %v354_v22 = vmax.f32 %v353_v14, 0.0  ;;  %v397_v25 = vstv %s1000_s12  ;;  %v327_v42 = vmul.f32 %v326_v37, %v324_v17  ;;  %v383_v27 = vadd.f32 %v382_v47, %v380_v18 }
  0xc7   :  { %v313_v26 = vadd.f32 %v312_v19, %v298_v53  ;;  %v410_v54 = vadd.f32 %v409_v38, %v406_v36  ;;  %v356_v55 = vstv %s1003_s18  ;;  %v412_v56 = vstv %s1012_s0 }
  0xc8   :  { %v342_v58 = vmul.f32 %v341_v21, %v339_v46  ;;  %v369_v52 = vmax.f32 %v368_v16, 0.0  ;;  %v398_v59 = vadd.f32 %v397_v25, %v395_v20  ;;  %v371_v24 = vstv %s1020_s14 }
  0xc9   :  { %v328_v57 = vadd.f32 %v327_v42, %v313_v26  ;;  %v357_v29 = vmul.f32 %v356_v55, %v354_v22  ;;  %v384_v60 = vmax.f32 %v383_v27, 0.0  ;;  %v413_v31 = vadd.f32 %v412_v56, %v410_v54 }
  0xca   :  { %v386_v23 = vstv %s1025_s27  ;;  %v372_v35 = vmul.f32 %v371_v24, %v369_v52  ;;  %v399_v62 = vmax.f32 %v398_v59, 0.0  ;;  %v401_v30 = vstv %s498_s4 }
  0xcb   :  { %v343_v28 = vadd.f32 %v342_v58, %v328_v57  ;;  %v387_v40 = vmul.f32 %v386_v23, %v384_v60  ;;  %v414_v41 = vmax.f32 %v413_v31, 0.0  ;;  %v416_v43 = vstv %s502_s6 }
  0xcc   :  { %v402_v0 = vmul.f32 %v401_v30, %v399_v62  ;;  %v420_v45 = vstv %s503_s7 }
  0xcd   :  { %v358_v61 = vadd.f32 %v357_v29, %v343_v28  ;;  %v417_v44 = vmul.f32 %v416_v43, %v414_v41 }
  0xcf   :  { %v373_v39 = vadd.f32 %v372_v35, %v358_v61 }
  0xd1   :  { %v388_v63 = vadd.f32 %v387_v40, %v373_v39 }
  0xd3   :  { %v403_v1 = vadd.f32 %v402_v0, %v388_v63 }
  0xd5   :  { %v418_v2 = vadd.f32 %v417_v44, %v403_v1 }
  0xd7   :  { %v421_v3 = vadd.f32 %v420_v45, %v418_v2 }
  0xd9   :  { %422 = vst [vmem:[#allocation5] sm:$0x3] %v421_v3 }
  0xda   :  { %433 = dma.vmem_to_hbm [thread:$0]  %s429_s1, 32, %s431_s20, [#allocation3]  }
  0xdb   :  { %544 = dma.done.wait [#allocation3], 32  }
  0xdc   :  { %545 = vsyncadd [#allocation3], 4294967264 }
  0xdd   :  { %438 = vsyncpa [#allocation3], 1 }
  0xde   :  { %439 = vsyncpa [#allocation4], 1 }

</bundles_post_ra>
